<compile_context>
chip_gen: v7x
topology: tpu7x:2x2x1
jax: 0.10.0
libtpu: 0.0.40
codegen_flags: <defaults>
</compile_context>

<pallas_src>
import jax
import jax.numpy as jnp
from jax.experimental import pallas as pl
from jax.experimental.pallas import tpu as pltpu

IN_CH = 3
HIDDEN = 50
OUT_CH = 100
HIDDEN_PAD = 128   # lane-dense hidden width (zero-padded)
OUT_PAD = 128      # lane-dense output width (zero-padded)
SUBLANE = 8        # f32 sublane count


def _round_up(n, m):
    return ((n + m - 1) // m) * m


def scale_layer_kernel(x_ref, w1_ref, b1_ref, w2_ref, b2_ref, o_ref):
    x = x_ref[...]            # (TB, IN_CH)  f32
    w1 = w1_ref[...]          # (IN_CH, HIDDEN_PAD), padded cols are zero

    # Layer 1: K=3 -> unrolled broadcast-FMA on the VPU (avoids a mostly-zero
    # MXU push). Padded lanes stay 0 because w1/b1 padded columns are zero.
    h = b1_ref[...] + x[:, 0:1] * w1[0:1, :]          # (TB, HIDDEN_PAD)
    for k in range(1, IN_CH):
        h = h + x[:, k:k + 1] * w1[k:k + 1, :]
    h = jnp.maximum(h, 0.0)                            # ReLU

    # Layer 2: (TB,128) @ (128,128) on the MXU, f32 accumulation.
    z = jnp.dot(h, w2_ref[...], preferred_element_type=jnp.float32) + b2_ref[...]

    # Sigmoid (fused logistic; exp lands on the EUP slot). Padded lanes become
    # 0.5 but are sliced off in the wrapper.
    o_ref[...] = jax.nn.sigmoid(z).astype(o_ref.dtype)


def scale_layer(x, w1, b1, w2, b2, *, tb=1024):
    """x: (B, IN_CH) f32; w1: (IN_CH, HIDDEN); b1: (HIDDEN,);
       w2: (HIDDEN, OUT_CH); b2: (OUT_CH,). Returns (B, OUT_CH, 1, 1) f32."""
    B = x.shape[0]

    # Zero-pad weights/biases to lane-dense feature widths. Padded columns/rows
    # are zero so ReLU/sigmoid on padded lanes can never leak into real outputs.
    w1p = jnp.zeros((IN_CH, HIDDEN_PAD), jnp.float32).at[:, :HIDDEN].set(w1)
    b1p = jnp.zeros((1, HIDDEN_PAD), jnp.float32).at[:, :HIDDEN].set(
        b1.reshape(1, HIDDEN))
    w2p = jnp.zeros((HIDDEN_PAD, OUT_PAD), jnp.float32).at[:HIDDEN, :OUT_CH].set(w2)
    b2p = jnp.zeros((1, OUT_PAD), jnp.float32).at[:, :OUT_CH].set(
        b2.reshape(1, OUT_CH))

    # Batch tile: multiple of 8 (f32 sublane), capped at `tb` (sized so
    # 2x(in)+2x(out) buffers stay well under v7x's 64 MiB VMEM).
    TB = min(_round_up(tb, SUBLANE), _round_up(B, SUBLANE))
    B_pad = _round_up(B, TB)
    xp = x.astype(jnp.float32)
    if B_pad != B:
        xp = jnp.zeros((B_pad, IN_CH), jnp.float32).at[:B, :].set(xp)

    out = pl.pallas_call(
        scale_layer_kernel,
        out_shape=jax.ShapeDtypeStruct((B_pad, OUT_PAD), jnp.float32),
        grid_spec=pltpu.PrefetchScalarGridSpec(
            num_scalar_prefetch=0,
            grid=(B_pad // TB,),
            in_specs=[
                pl.BlockSpec((TB, IN_CH), lambda i: (i, 0)),          # x tiles
                pl.BlockSpec((IN_CH, HIDDEN_PAD), lambda i: (0, 0)),  # resident
                pl.BlockSpec((1, HIDDEN_PAD), lambda i: (0, 0)),      # resident
                pl.BlockSpec((HIDDEN_PAD, OUT_PAD), lambda i: (0, 0)),# resident
                pl.BlockSpec((1, OUT_PAD), lambda i: (0, 0)),         # resident
            ],
            out_specs=pl.BlockSpec((TB, OUT_PAD), lambda i: (i, 0)),
        ),
        compiler_params=pltpu.CompilerParams(
            dimension_semantics=("parallel",),  # shard batch tiles across TCs (v7x)
        ),
    )(xp, w1p, b1p, w2p, b2p)

    # PyTorch: scale.reshape([B, C, 1, 1]) — pure layout glue done in JAX.
    return out[:B, :OUT_CH].reshape(B, OUT_CH, 1, 1)


def init_params(key):
    """PyTorch-Linear-style init; weights stored transposed as (in, out)."""
    k1, k2, k3, k4 = jax.random.split(key, 4)
    bound1 = 1.0 / (IN_CH ** 0.5)
    bound2 = 1.0 / (HIDDEN ** 0.5)
    w1 = jax.random.uniform(k1, (IN_CH, HIDDEN), jnp.float32, -bound1, bound1)
    b1 = jax.random.uniform(k2, (HIDDEN,), jnp.float32, -bound1, bound1)
    w2 = jax.random.uniform(k3, (HIDDEN, OUT_CH), jnp.float32, -bound2, bound2)
    b2 = jax.random.uniform(k4, (OUT_CH,), jnp.float32, -bound2, bound2)
    return w1, b1, w2, b2


def reference(x, w1, b1, w2, b2):
    h = jnp.maximum(x @ w1 + b1[None, :], 0.0)
    z = h @ w2 + b2[None, :]
    return (1.0 / (1.0 + jnp.exp(-z))).reshape(x.shape[0], OUT_CH, 1, 1)


if __name__ == "__main__":
    key = jax.random.PRNGKey(0)
    kx, kp, kx2 = jax.random.split(key, 3)
    w1, b1, w2, b2 = init_params(kp)

    # Primary check: small batch, multiple of sublane count.
    B = 8
    x = jax.random.normal(kx, (B, IN_CH), jnp.float32)
    out = jax.block_until_ready(scale_layer(x, w1, b1, w2, b2))
    ref = reference(x, w1, b1, w2, b2)
    assert out.shape == (B, OUT_CH, 1, 1), out.shape
    assert jnp.allclose(out, ref, atol=1e-5, rtol=1e-5), "mismatch vs reference (B=8)"

    # Padding path check: batch not a multiple of 8.
    B2 = 13
    x2 = jax.random.normal(kx2, (B2, IN_CH), jnp.float32)
    out2 = jax.block_until_ready(scale_layer(x2, w1, b1, w2, b2))
    ref2 = reference(x2, w1, b1, w2, b2)
    assert out2.shape == (B2, OUT_CH, 1, 1), out2.shape
    assert jnp.allclose(out2, ref2, atol=1e-5, rtol=1e-5), "mismatch vs reference (B=13)"

    print("KERNEL_OK")
</pallas_src>

<mosaic_0001>
module attributes {stable_mosaic.version = 11 : i64} {
  func.func @scale_layer_kernel(%arg0: i32, %arg1: memref<8x3xf32, #tpu.memory_space<vmem>>, %arg2: memref<3x128xf32, #tpu.memory_space<vmem>>, %arg3: memref<1x128xf32, #tpu.memory_space<vmem>>, %arg4: memref<128x128xf32, #tpu.memory_space<vmem>>, %arg5: memref<1x128xf32, #tpu.memory_space<vmem>>, %arg6: memref<8x128xf32, #tpu.memory_space<vmem>>) attributes {dimension_semantics = [#tpu.dimension_semantics<parallel>], iteration_bounds = array<i64: 1>, scalar_prefetch = 0 : i64, scratch_operands = 0 : i64, tpu.core_type = #tpu.core_type<tc>, window_params = [{transform_indices = @transform_0, window_bounds = array<i64: 8, 3>}, {pipeline_mode = #tpu.pipeline_mode<synchronous>, transform_indices = @transform_1, window_bounds = array<i64: 3, 128>}, {pipeline_mode = #tpu.pipeline_mode<synchronous>, transform_indices = @transform_2, window_bounds = array<i64: 1, 128>}, {pipeline_mode = #tpu.pipeline_mode<synchronous>, transform_indices = @transform_3, window_bounds = array<i64: 128, 128>}, {pipeline_mode = #tpu.pipeline_mode<synchronous>, transform_indices = @transform_4, window_bounds = array<i64: 1, 128>}, {transform_indices = @transform_5, window_bounds = array<i64: 8, 128>}]} {
    %c0 = arith.constant 0 : index
    %c0_0 = arith.constant 0 : index
    %0 = vector.load %arg1[%c0, %c0_0] : memref<8x3xf32, #tpu.memory_space<vmem>>, vector<8x3xf32>
    %c0_1 = arith.constant 0 : index
    %c0_2 = arith.constant 0 : index
    %1 = vector.load %arg2[%c0_1, %c0_2] : memref<3x128xf32, #tpu.memory_space<vmem>>, vector<3x128xf32>
    %c0_3 = arith.constant 0 : index
    %c0_4 = arith.constant 0 : index
    %2 = vector.load %arg3[%c0_3, %c0_4] : memref<1x128xf32, #tpu.memory_space<vmem>>, vector<1x128xf32>
    %3 = vector.extract_strided_slice %0 {offsets = [0, 0], sizes = [8, 1], strides = [1, 1]} : vector<8x3xf32> to vector<8x1xf32>
    %4 = vector.extract_strided_slice %1 {offsets = [0, 0], sizes = [1, 128], strides = [1, 1]} : vector<3x128xf32> to vector<1x128xf32>
    %5 = vector.broadcast %3 : vector<8x1xf32> to vector<8x128xf32>
    %6 = vector.broadcast %4 : vector<1x128xf32> to vector<8x128xf32>
    %7 = arith.mulf %5, %6 : vector<8x128xf32>
    %8 = vector.broadcast %2 : vector<1x128xf32> to vector<8x128xf32>
    %9 = arith.addf %8, %7 : vector<8x128xf32>
    %10 = vector.extract_strided_slice %0 {offsets = [0, 1], sizes = [8, 1], strides = [1, 1]} : vector<8x3xf32> to vector<8x1xf32>
    %11 = vector.extract_strided_slice %1 {offsets = [1, 0], sizes = [1, 128], strides = [1, 1]} : vector<3x128xf32> to vector<1x128xf32>
    %12 = vector.broadcast %10 : vector<8x1xf32> to vector<8x128xf32>
    %13 = vector.broadcast %11 : vector<1x128xf32> to vector<8x128xf32>
    %14 = arith.mulf %12, %13 : vector<8x128xf32>
    %15 = arith.addf %9, %14 : vector<8x128xf32>
    %16 = vector.extract_strided_slice %0 {offsets = [0, 2], sizes = [8, 1], strides = [1, 1]} : vector<8x3xf32> to vector<8x1xf32>
    %17 = vector.extract_strided_slice %1 {offsets = [2, 0], sizes = [1, 128], strides = [1, 1]} : vector<3x128xf32> to vector<1x128xf32>
    %18 = vector.broadcast %16 : vector<8x1xf32> to vector<8x128xf32>
    %19 = vector.broadcast %17 : vector<1x128xf32> to vector<8x128xf32>
    %20 = arith.mulf %18, %19 : vector<8x128xf32>
    %21 = arith.addf %15, %20 : vector<8x128xf32>
    %cst = arith.constant 0.000000e+00 : f32
    %22 = vector.broadcast %cst : f32 to vector<8x128xf32>
    %23 = arith.maximumf %21, %22 : vector<8x128xf32>
    %c0_5 = arith.constant 0 : index
    %c0_6 = arith.constant 0 : index
    %24 = vector.load %arg4[%c0_5, %c0_6] : memref<128x128xf32, #tpu.memory_space<vmem>>, vector<128x128xf32>
    %cst_7 = arith.constant dense<0.000000e+00> : vector<8x128xf32>
    %25 = tpu.matmul %23, %24, %cst_7 {dimension_numbers = #tpu.dot_dimension_numbers<[1], [0], [0], [1], [0, 0, 1, 1], [], []>} : vector<8x128xf32>, vector<128x128xf32>, vector<8x128xf32> -> vector<8x128xf32>
    %c0_8 = arith.constant 0 : index
    %c0_9 = arith.constant 0 : index
    %26 = vector.load %arg5[%c0_8, %c0_9] : memref<1x128xf32, #tpu.memory_space<vmem>>, vector<1x128xf32>
    %27 = vector.broadcast %26 : vector<1x128xf32> to vector<8x128xf32>
    %28 = arith.addf %25, %27 : vector<8x128xf32>
    %29 = arith.negf %28 : vector<8x128xf32>
    %30 = math.exp %29 : vector<8x128xf32>
    %cst_10 = arith.constant 1.000000e+00 : f32
    %31 = vector.broadcast %cst_10 : f32 to vector<8x128xf32>
    %32 = arith.addf %31, %30 : vector<8x128xf32>
    %33 = arith.divf %31, %32 : vector<8x128xf32>
    %c0_11 = arith.constant 0 : index
    %c0_12 = arith.constant 0 : index
    %34 = vector.load %arg6[%c0_11, %c0_12] : memref<8x128xf32, #tpu.memory_space<vmem>>, vector<8x128xf32>
    tpu.vector_store %arg6[%c0_11, %c0_12], %33 {strides = array<i32>} : memref<8x128xf32, #tpu.memory_space<vmem>>, vector<8x128xf32>,
    return
  }
  func.func @transform_0(%arg0: i32) -> (i32, i32) {
    %c0_i32 = arith.constant 0 : i32
    %c0_i32_0 = arith.constant 0 : i32
    return %arg0, %c0_i32 : i32, i32
  }
  func.func @transform_1(%arg0: i32) -> (i32, i32) {
    %c0_i32 = arith.constant 0 : i32
    %c0_i32_0 = arith.constant 0 : i32
    %c0_i32_1 = arith.constant 0 : i32
    return %c0_i32, %c0_i32_0 : i32, i32
  }
  func.func @transform_2(%arg0: i32) -> (i32, i32) {
    %c0_i32 = arith.constant 0 : i32
    %c0_i32_0 = arith.constant 0 : i32
    %c0_i32_1 = arith.constant 0 : i32
    return %c0_i32, %c0_i32_0 : i32, i32
  }
  func.func @transform_3(%arg0: i32) -> (i32, i32) {
    %c0_i32 = arith.constant 0 : i32
    %c0_i32_0 = arith.constant 0 : i32
    %c0_i32_1 = arith.constant 0 : i32
    return %c0_i32, %c0_i32_0 : i32, i32
  }
  func.func @transform_4(%arg0: i32) -> (i32, i32) {
    %c0_i32 = arith.constant 0 : i32
    %c0_i32_0 = arith.constant 0 : i32
    %c0_i32_1 = arith.constant 0 : i32
    return %c0_i32, %c0_i32_0 : i32, i32
  }
  func.func @transform_5(%arg0: i32) -> (i32, i32) {
    %c0_i32 = arith.constant 0 : i32
    %c0_i32_0 = arith.constant 0 : i32
    return %arg0, %c0_i32 : i32, i32
  }
}

</mosaic_0001>

<bundles_post_ra>
// kernel: tpu_custom_call.1
= control target key start
LH: loop header
LB: loop body
LE: loop exit
PB: predicated region body
PF: predicated region fallthrough
CT: control target
= control target key end

     0   :  { %10 = vsyncpa [#allocation3], 0  ;;  %s412_s0 = inlined_call_operand.vmem [shape: f32[8,3], index: 0, kind: input, shape index: {}]   ;;  %s413_s1 = inlined_call_operand.vmem [shape: f32[3,128], index: 1, kind: input, shape index: {}]   ;;  %s414_s2 = inlined_call_operand.vmem [shape: f32[1,128], index: 2, kind: input, shape index: {}]   ;;  %s415_s3 = inlined_call_operand.hbm [shape: f32[128,128], index: 3, kind: input, shape index: {}]   ;;  %s416_s4 = inlined_call_operand.vmem [shape: f32[1,128], index: 4, kind: input, shape index: {}]   ;;  %s417_s5 = inlined_call_operand.hbm [shape: f32[8,128], index: 5, kind: output, shape index: {}]  }
   0x1   :  { %11 = vsyncpa [#allocation4], 0  ;;  %s336_s18 = smov [#allocation2]   ;;  %s288_s22 = scalar_lea.hbm %s415_s3, 2048 }
   0x2   :  { %s23_s19 = sshll.u32 %s336_s18, 4  ;;  %p289_p0 = scmp.ne.s32.totalorder %s415_s3, %s288_s22  ;;  %s24_s19 = int_to_ptr.vmem [resolvable:$true] %s23_s19 }
   0x3   :  { %p292_p1 = scmp.lt.u32.totalorder %s288_s22, %s415_s3 }
   0x5   :  { %p294_p2 = pnand %p292_p1, %p289_p0 }
   0x7   :  { %297 = shalt.err (!%p294_p2)
}
   0x8   :  { %s298_s27 = scalar_lea.vmem %s24_s19, 2048  ;;  %p303_p4 = scmp.lt.s32.totalorder %s24_s19, %s24_s19 }
   0x9   :  { %p299_p3 = scmp.ne.s32.totalorder %s24_s19, %s298_s27  ;;  %p304_p5 = scmp.lt.s32.totalorder %s298_s27, %s298_s27 }
   0xb   :  { %p305_p6 = por %p304_p5, %p303_p4 }
   0xd   :  { %p306_p7 = pnand %p305_p6, %p299_p3 }
   0xf   :  { %309 = shalt.err (!%p306_p7)
}
  0x10   :  { %s337_s28 = smov 128   ;;  %s338_s29 = smov 8  }
  0x11   :  { %29 = dma.hbm_to_vmem [thread:$0]  %s415_s3, 2048, %s24_s19, [#allocation3], %s337_s28, %s337_s28, %s338_s29  }
  0x12   :  { %332 = dma.done.wait [#allocation3], 2048  }
  0x13   :  { %333 = vsyncadd [#allocation3], 4294965248  ;;  %v339_v0 = vmov 0   ;;  %v340_v1 = vmov 2   ;;  %v341_v2 = vmov 0.0|0.0   ;;  %v35_v3 = vld [vmem:[%s412_s0] sm:$0xff]  ;;  %v43_v30 = vlaneseq }
  0x14   :  { %280 = vset.pattern.permute.xlu0 %v339_v0  ;;  %282 = vset.pattern.permute.xlu1 %v340_v1  ;;  %v76_v4 = vld [vmem:[#allocation2] sm:$0xff]  ;;  %v77_v5 = vld [vmem:[#allocation2 + $0x8] sm:$0xff]  ;;  %v78_v7 = vld [vmem:[#allocation2 + $0x10] sm:$0xff]  ;;  %v342_v12 = vmov 1   ;;  %vm343_vm0 = vmmov 0   ;;  %v344_v19 = vmov 0.0  }
  0x15   :  { %246 = vmatprep.subr.bf16.mxu0 %v341_v2  ;;  %40 = vperm.xlu0 %280, %v35_v3   ;;  %v247_v6 = vpack.c.bf16 %v77_v5, %v76_v4  ;;  %v79_v8 = vld [vmem:[#allocation2 + $0x18] sm:$0xff]  ;;  %v80_v10 = vld [vmem:[#allocation2 + $0x20] sm:$0xff]  ;;  %v81_v11 = vld [vmem:[#allocation2 + $0x28] sm:$0xff]  ;;  %v44_v31 = vshrl.u32 %v43_v30, 7 }
  0x16   :  { %66 = vperm.xlu1 %282, %v35_v3   ;;  %v250_v9 = vpack.c.bf16 %v79_v8, %v78_v7  ;;  %v253_v13 = vpack.c.bf16 %v81_v11, %v80_v10  ;;  %v82_v14 = vld [vmem:[#allocation2 + $0x30] sm:$0xff]  ;;  %v83_v15 = vld [vmem:[#allocation2 + $0x38] sm:$0xff]  ;;  %v84_v17 = vld [vmem:[#allocation2 + $0x40] sm:$0xff]  ;;  %243 = vmatprep.mubr.msk.f32.mxu0 %vm343_vm0, %v344_v19 }
  0x17   :  { %248 = vmatpush3.bf16.msra.mxu0 %v247_v6  ;;  %v256_v16 = vpack.c.bf16 %v83_v15, %v82_v14  ;;  %v85_v18 = vld [vmem:[#allocation2 + $0x48] sm:$0xff]  ;;  %v86_v21 = vld [vmem:[#allocation2 + $0x50] sm:$0xff]  ;;  %v87_v22 = vld [vmem:[#allocation2 + $0x58] sm:$0xff]  ;;  %v45_v32 = vsub.s32 0, %v44_v31  ;;  %v61_v35 = vsub.s32 1, %v44_v31  ;;  %v71_v36 = vsub.s32 2, %v44_v31 }
  0x18   :  { %249 = vmatprep.subr.bf16.mxu0 %v341_v2  ;;  %v259_v20 = vpack.c.bf16 %v85_v18, %v84_v17  ;;  %v262_v23 = vpack.c.bf16 %v87_v22, %v86_v21  ;;  %v88_v24 = vld [vmem:[#allocation2 + $0x60] sm:$0xff]  ;;  %v89_v25 = vld [vmem:[#allocation2 + $0x68] sm:$0xff]  ;;  %v90_v27 = vld [vmem:[#allocation2 + $0x70] sm:$0xff] }
  0x19   :  { %281 = vset.pattern.permute.xlu0 %v342_v12  ;;  %v265_v26 = vpack.c.bf16 %v89_v25, %v88_v24  ;;  %v91_v28 = vld [vmem:[#allocation2 + $0x78] sm:$0xff]  ;;  %v36_v33 = vld [vmem:[%s413_s1] sm:$0x7] }
  0x1a   :  { %56 = vperm.xlu0 %281, %v35_v3   ;;  %v268_v29 = vpack.c.bf16 %v91_v28, %v90_v27  ;;  %v46_v34 = vrot.slane %v36_v33, %v45_v32  ;;  %v62_v39 = vrot.slane %v36_v33, %v61_v35  ;;  %v72_v40 = vrot.slane %v36_v33, %v71_v36  ;;  %v191_v41 = vld [vmem:[%s414_s2] ss:$0 sm:$0xff]  ;;  %s345_s2 = smov [#allocation5]  }
  0x1b   :  { %251 = vmatpush3.bf16.msra.mxu0 %v250_v9  ;;  %v192_v50 = vld [vmem:[%s416_s4] ss:$0 sm:$0xff]  ;;  %s182_s12 = sshll.u32 %s345_s2, 4  ;;  %s183_s12 = int_to_ptr.vmem [resolvable:$true] %s182_s12 }
  0x1c   :  { %252 = vmatprep.subr.bf16.mxu0 %v341_v2  ;;  %s310_s13 = scalar_lea.vmem %s183_s12, 128  ;;  %p315_p9 = scmp.lt.s32.totalorder %s183_s12, %s183_s12 }
  0x1d   :  { %p311_p8 = scmp.ne.s32.totalorder %s183_s12, %s310_s13  ;;  %p316_p10 = scmp.lt.s32.totalorder %s310_s13, %s310_s13 }
  0x1e   :  { %283 = vset.pattern.permute.xlu0 %v340_v1 }
  0x1f   :  { %254 = vmatpush3.bf16.msra.mxu0 %v253_v13  ;;  %p317_p11 = por %p316_p10, %p315_p9 }
  0x20   :  { %255 = vmatprep.subr.bf16.mxu0 %v341_v2 }
  0x21   :  { %p318_p12 = pnand %p317_p11, %p311_p8 }
  0x23   :  { %257 = vmatpush3.bf16.msra.mxu0 %v256_v16 }
  0x24   :  { %258 = vmatprep.subr.bf16.mxu0 %v341_v2 }
  0x27   :  { %260 = vmatpush3.bf16.msra.mxu0 %v259_v20 }
  0x28   :  { %261 = vmatprep.subr.bf16.mxu0 %v341_v2 }
  0x2b   :  { %263 = vmatpush3.bf16.msra.mxu0 %v262_v23 }
  0x2c   :  { %264 = vmatprep.subr.bf16.mxu0 %v341_v2 }
  0x2f   :  { %266 = vmatpush3.bf16.msra.mxu0 %v265_v26 }
  0x30   :  { %267 = vmatprep.subr.bf16.mxu0 %v341_v2 }
  0x33   :  { %269 = vmatpush3.bf16.msra.mxu0 %v268_v29 }
  0x94   :  { %v41_v37 = vpop.permute.xlu0 %40 }
  0x95   :  { %v47_v38 = vmul.f32 %v46_v34, %v41_v37  ;;  %v67_v42 = vpop.permute.xlu1 %66 }
  0x96   :  { %v73_v46 = vmul.f32 %v72_v40, %v67_v42 }
  0x97   :  { %v54_v44 = vadd.f32 %v191_v41, %v47_v38 }
  0x99   :  { %v57_v43 = vpop.permute.xlu0 %56 }
  0x9a   :  { %v63_v45 = vmul.f32 %v62_v39, %v57_v43 }
  0x9c   :  { %v64_v47 = vadd.f32 %v63_v45, %v54_v44 }
  0x9e   :  { %v74_v48 = vadd.f32 %v73_v46, %v64_v47 }
  0xa0   :  { %v75_v49 = vmax.f32 %v74_v48, 0.0 }
  0xa2   :  { %244 = vmatmul.mubr.f32.vlgmr.msra.gmra.mrb[0].mxu0 %v75_v49 }
 0x175   :  { %v165_v51 = vpop.f32.mrb[0].mxu0 }
 0x176   :  { %v166_v52 = vadd.f32 %v192_v50, %v165_v51  ;;  %v245_v53 = vpop.f32.mrb[1].mxu0 }
 0x178   :  { %v193_v54 = vmul.f32 -1.442695, %v166_v52 }
 0x17a   :  { %284 = vpow2.f32 %v193_v54 }
 0x184   :  { %v285_v55 = vpop.eup %284 }
 0x185   :  { %v172_v56 = vadd.f32 1.0, %v285_v55 }
 0x187   :  { %286 = vrcp.f32 %v172_v56 }
 0x191   :  { %v287_v57 = vpop.eup %286 }
 0x192   :  { %175 = vst [vmem:[#allocation5] sm:$0xff] %v287_v57 }
 0x193   :  { %321 = shalt.err (!%p318_p12)
}
 0x194   :  { %s322_s15 = scalar_lea.hbm %s417_s5, 128 }
 0x195   :  { %p323_p13 = scmp.ne.s32.totalorder %s417_s5, %s322_s15  ;;  %p326_p0 = scmp.lt.u32.totalorder %s322_s15, %s417_s5 }
 0x197   :  { %p328_p1 = pnand %p326_p0, %p323_p13 }
 0x199   :  { %331 = shalt.err (!%p328_p1)
}
 0x19a   :  { %185 = dma.vmem_to_hbm [thread:$0]  %s183_s12, 128, %s417_s5, [#allocation4]  }
 0x19b   :  { %334 = dma.done.wait [#allocation4], 128  }
 0x19c   :  { %335 = vsyncadd [#allocation4], 4294967168 }
 0x19d   :  { %189 = vsyncpa [#allocation3], 1 }
 0x19e   :  { %190 = vsyncpa [#allocation4], 1 }

</bundles_post_ra>
